<compile_context>
chip_gen: v7x
topology: tpu7x:2x2x1
jax: 0.10.0
libtpu: 0.0.40
codegen_flags: <defaults>
</compile_context>

<pallas_src>
import functools

import jax
import jax.numpy as jnp
from jax.experimental import pallas as pl
from jax.experimental.pallas import tpu as pltpu


def _kmax_pool_kernel(x_ref, o_ref, *, top_k, out_w):
    # x_ref: (TR, L) block of rows from the flattened (B*C, L) input.
    x = x_ref[...].astype(jnp.float32)
    tr, L = x.shape

    idx = jax.lax.broadcasted_iota(jnp.int32, (tr, L), dimension=1)
    neg_inf = jnp.float32(-jnp.inf)

    # ---- Phase 1: pick the top_k largest values per row (earliest index wins
    # on ties, matching jax.lax.top_k / torch.topk).  O(k * L) work:
    # each iteration is one lane-max, one lane-min and a couple of selects.
    work = x
    selected = jnp.zeros((tr, L), dtype=jnp.bool_)
    for _ in range(top_k):
        row_max = jnp.max(work, axis=1, keepdims=True)           # (TR, 1)
        is_max = work == row_max
        first = jnp.min(jnp.where(is_max, idx, L), axis=1, keepdims=True)
        pick = idx == first                                      # (TR, L)
        selected = selected | pick
        work = jnp.where(pick, neg_inf, work)

    # ---- Phase 2: emit the selected values in original index order.
    # Repeatedly take the smallest remaining selected index (k lane-min
    # reductions + k lane-sum reductions; no (TR, L, L) tensors, no cumsum).
    sel_idx = jnp.where(selected, idx, L)                        # (TR, L) int32
    cols = []
    for _ in range(top_k):
        nxt = jnp.min(sel_idx, axis=1, keepdims=True)            # (TR, 1)
        take = sel_idx == nxt
        cols.append(jnp.sum(jnp.where(take, x, 0.0), axis=1, keepdims=True))
        sel_idx = jnp.where(take, L, sel_idx)

    # Lane-dense store: pad the k result columns up to out_w (multiple of 128)
    # so the output store is a single unmasked contiguous vst.
    if out_w > top_k:
        cols.append(jnp.zeros((tr, out_w - top_k), jnp.float32))
    o_ref[...] = jnp.concatenate(cols, axis=1).astype(o_ref.dtype)


def kmax_pool1d(inputs, top_k):
    """K-max pooling along dim=2 of a (B, C, L) tensor, order-preserving."""
    assert inputs.ndim == 3
    B, C, L = inputs.shape
    assert top_k <= L, "top_k must be <= sequence length (PyTorch would raise)"
    rows = B * C
    x2 = inputs.reshape(rows, L)

    # Fixed, sublane-aligned row block: bounds VMEM independent of B*C,
    # enables double-buffering + megacore sharding for large row counts.
    TR = 128 if rows >= 128 else int(pl.cdiv(rows, 8)) * 8
    rows_pad = int(pl.cdiv(rows, TR)) * TR
    if rows_pad != rows:
        x2 = jnp.pad(x2, ((0, rows_pad - rows), (0, 0)))

    # Lane-dense (>=128-wide) padded output; sliced back to top_k below.
    out_w = max(128, int(pl.cdiv(top_k, 128)) * 128)

    kernel = functools.partial(_kmax_pool_kernel, top_k=top_k, out_w=out_w)
    out = pl.pallas_call(
        kernel,
        out_shape=jax.ShapeDtypeStruct((rows_pad, out_w), inputs.dtype),
        grid=(rows_pad // TR,),
        in_specs=[pl.BlockSpec((TR, L), lambda r: (r, 0))],
        out_specs=pl.BlockSpec((TR, out_w), lambda r: (r, 0)),
        compiler_params=pltpu.CompilerParams(
            dimension_semantics=("parallel",)),
    )(x2)
    return out[:rows, :top_k].reshape(B, C, top_k)


def _reference_kmax(inputs, top_k):
    # Pure-JAX reference mirroring the PyTorch module.
    _, idxs = jax.lax.top_k(inputs, top_k)          # indices of top-k along last dim
    sorted_idx = jnp.sort(idxs, axis=-1)            # sort indices ascending
    return jnp.take_along_axis(inputs, sorted_idx, axis=-1)


if __name__ == "__main__":
    key = jax.random.PRNGKey(0)

    # Case 1: shapes matching the module's typical usage.
    B, C, L = 2, 4, 16
    top_k = 3
    x = jax.random.normal(key, (B, C, L), dtype=jnp.float32)
    out = jax.block_until_ready(kmax_pool1d(x, top_k))
    ref = _reference_kmax(x, top_k)
    assert out.shape == (B, C, top_k), out.shape
    assert jnp.allclose(out, ref, atol=1e-6, rtol=1e-6), (out, ref)

    # Case 2: exercises row padding (B*C not a multiple of the row block).
    B2, C2, L2, k2 = 3, 5, 40, 5
    x2 = jax.random.normal(jax.random.PRNGKey(1), (B2, C2, L2), dtype=jnp.float32)
    out2 = jax.block_until_ready(kmax_pool1d(x2, k2))
    ref2 = _reference_kmax(x2, k2)
    assert out2.shape == (B2, C2, k2), out2.shape
    assert jnp.allclose(out2, ref2, atol=1e-6, rtol=1e-6), (out2, ref2)

    print("KERNEL_OK")
</pallas_src>

<mosaic_0001>
module attributes {stable_mosaic.version = 11 : i64} {
  func.func @_kmax_pool_kernel(%arg0: i32, %arg1: memref<8x16xf32, #tpu.memory_space<vmem>>, %arg2: memref<8x128xf32, #tpu.memory_space<vmem>>) attributes {dimension_semantics = [#tpu.dimension_semantics<parallel>], iteration_bounds = array<i64: 1>, scalar_prefetch = 0 : i64, scratch_operands = 0 : i64, tpu.core_type = #tpu.core_type<tc>, window_params = [{transform_indices = @transform_0, window_bounds = array<i64: 8, 16>}, {transform_indices = @transform_1, window_bounds = array<i64: 8, 128>}]} {
    %c0 = arith.constant 0 : index
    %c0_0 = arith.constant 0 : index
    %0 = vector.load %arg1[%c0, %c0_0] : memref<8x16xf32, #tpu.memory_space<vmem>>, vector<8x16xf32>
    %1 = tpu.iota {dimensions = array<i32: 1>} : vector<8x16xi32>
    %false = arith.constant false
    %2 = vector.broadcast %false : i1 to vector<8x16xi1>
    %cst = arith.constant dense<0xFF800000> : vector<8xf32>
    %3 = vector.multi_reduction <maximumf>, %0, %cst [1] : vector<8x16xf32> to vector<8xf32>
    %4 = vector.shape_cast %3 : vector<8xf32> to vector<8x1xf32>
    %5 = vector.broadcast %4 : vector<8x1xf32> to vector<8x16xf32>
    %6 = arith.cmpf oeq, %0, %5 : vector<8x16xf32>
    %c16_i32 = arith.constant 16 : i32
    %7 = vector.broadcast %c16_i32 : i32 to vector<8x16xi32>
    %8 = arith.select %6, %1, %7 : vector<8x16xi1>, vector<8x16xi32>
    %cst_1 = arith.constant dense<2147483647> : vector<8xi32>
    %9 = vector.multi_reduction <minsi>, %8, %cst_1 [1] : vector<8x16xi32> to vector<8xi32>
    %10 = vector.shape_cast %9 : vector<8xi32> to vector<8x1xi32>
    %11 = vector.broadcast %10 : vector<8x1xi32> to vector<8x16xi32>
    %12 = arith.cmpi eq, %1, %11 : vector<8x16xi32>
    %13 = arith.ori %2, %12 : vector<8x16xi1>
    %cst_2 = arith.constant 0xFF800000 : f32
    %14 = vector.broadcast %cst_2 : f32 to vector<8x16xf32>
    %15 = arith.select %12, %14, %0 : vector<8x16xi1>, vector<8x16xf32>
    %cst_3 = arith.constant dense<0xFF800000> : vector<8xf32>
    %16 = vector.multi_reduction <maximumf>, %15, %cst_3 [1] : vector<8x16xf32> to vector<8xf32>
    %17 = vector.shape_cast %16 : vector<8xf32> to vector<8x1xf32>
    %18 = vector.broadcast %17 : vector<8x1xf32> to vector<8x16xf32>
    %19 = arith.cmpf oeq, %15, %18 : vector<8x16xf32>
    %c16_i32_4 = arith.constant 16 : i32
    %20 = vector.broadcast %c16_i32_4 : i32 to vector<8x16xi32>
    %21 = arith.select %19, %1, %20 : vector<8x16xi1>, vector<8x16xi32>
    %cst_5 = arith.constant dense<2147483647> : vector<8xi32>
    %22 = vector.multi_reduction <minsi>, %21, %cst_5 [1] : vector<8x16xi32> to vector<8xi32>
    %23 = vector.shape_cast %22 : vector<8xi32> to vector<8x1xi32>
    %24 = vector.broadcast %23 : vector<8x1xi32> to vector<8x16xi32>
    %25 = arith.cmpi eq, %1, %24 : vector<8x16xi32>
    %26 = arith.ori %13, %25 : vector<8x16xi1>
    %cst_6 = arith.constant 0xFF800000 : f32
    %27 = vector.broadcast %cst_6 : f32 to vector<8x16xf32>
    %28 = arith.select %25, %27, %15 : vector<8x16xi1>, vector<8x16xf32>
    %cst_7 = arith.constant dense<0xFF800000> : vector<8xf32>
    %29 = vector.multi_reduction <maximumf>, %28, %cst_7 [1] : vector<8x16xf32> to vector<8xf32>
    %30 = vector.shape_cast %29 : vector<8xf32> to vector<8x1xf32>
    %31 = vector.broadcast %30 : vector<8x1xf32> to vector<8x16xf32>
    %32 = arith.cmpf oeq, %28, %31 : vector<8x16xf32>
    %c16_i32_8 = arith.constant 16 : i32
    %33 = vector.broadcast %c16_i32_8 : i32 to vector<8x16xi32>
    %34 = arith.select %32, %1, %33 : vector<8x16xi1>, vector<8x16xi32>
    %cst_9 = arith.constant dense<2147483647> : vector<8xi32>
    %35 = vector.multi_reduction <minsi>, %34, %cst_9 [1] : vector<8x16xi32> to vector<8xi32>
    %36 = vector.shape_cast %35 : vector<8xi32> to vector<8x1xi32>
    %37 = vector.broadcast %36 : vector<8x1xi32> to vector<8x16xi32>
    %38 = arith.cmpi eq, %1, %37 : vector<8x16xi32>
    %39 = arith.ori %26, %38 : vector<8x16xi1>
    %c16_i32_10 = arith.constant 16 : i32
    %40 = vector.broadcast %c16_i32_10 : i32 to vector<8x16xi32>
    %41 = arith.select %39, %1, %40 : vector<8x16xi1>, vector<8x16xi32>
    %cst_11 = arith.constant dense<2147483647> : vector<8xi32>
    %42 = vector.multi_reduction <minsi>, %41, %cst_11 [1] : vector<8x16xi32> to vector<8xi32>
    %43 = vector.shape_cast %42 : vector<8xi32> to vector<8x1xi32>
    %44 = vector.broadcast %43 : vector<8x1xi32> to vector<8x16xi32>
    %45 = arith.cmpi eq, %41, %44 : vector<8x16xi32>
    %cst_12 = arith.constant 0.000000e+00 : f32
    %46 = vector.broadcast %cst_12 : f32 to vector<8x16xf32>
    %47 = arith.select %45, %0, %46 : vector<8x16xi1>, vector<8x16xf32>
    %cst_13 = arith.constant dense<0.000000e+00> : vector<8xf32>
    %48 = vector.multi_reduction <add>, %47, %cst_13 [1] : vector<8x16xf32> to vector<8xf32>
    %49 = vector.shape_cast %48 : vector<8xf32> to vector<8x1xf32>
    %c16_i32_14 = arith.constant 16 : i32
    %50 = vector.broadcast %c16_i32_14 : i32 to vector<8x16xi32>
    %51 = arith.select %45, %50, %41 : vector<8x16xi1>, vector<8x16xi32>
    %cst_15 = arith.constant dense<2147483647> : vector<8xi32>
    %52 = vector.multi_reduction <minsi>, %51, %cst_15 [1] : vector<8x16xi32> to vector<8xi32>
    %53 = vector.shape_cast %52 : vector<8xi32> to vector<8x1xi32>
    %54 = vector.broadcast %53 : vector<8x1xi32> to vector<8x16xi32>
    %55 = arith.cmpi eq, %51, %54 : vector<8x16xi32>
    %cst_16 = arith.constant 0.000000e+00 : f32
    %56 = vector.broadcast %cst_16 : f32 to vector<8x16xf32>
    %57 = arith.select %55, %0, %56 : vector<8x16xi1>, vector<8x16xf32>
    %cst_17 = arith.constant dense<0.000000e+00> : vector<8xf32>
    %58 = vector.multi_reduction <add>, %57, %cst_17 [1] : vector<8x16xf32> to vector<8xf32>
    %59 = vector.shape_cast %58 : vector<8xf32> to vector<8x1xf32>
    %c16_i32_18 = arith.constant 16 : i32
    %60 = vector.broadcast %c16_i32_18 : i32 to vector<8x16xi32>
    %61 = arith.select %55, %60, %51 : vector<8x16xi1>, vector<8x16xi32>
    %cst_19 = arith.constant dense<2147483647> : vector<8xi32>
    %62 = vector.multi_reduction <minsi>, %61, %cst_19 [1] : vector<8x16xi32> to vector<8xi32>
    %63 = vector.shape_cast %62 : vector<8xi32> to vector<8x1xi32>
    %64 = vector.broadcast %63 : vector<8x1xi32> to vector<8x16xi32>
    %65 = arith.cmpi eq, %61, %64 : vector<8x16xi32>
    %cst_20 = arith.constant 0.000000e+00 : f32
    %66 = vector.broadcast %cst_20 : f32 to vector<8x16xf32>
    %67 = arith.select %65, %0, %66 : vector<8x16xi1>, vector<8x16xf32>
    %cst_21 = arith.constant dense<0.000000e+00> : vector<8xf32>
    %68 = vector.multi_reduction <add>, %67, %cst_21 [1] : vector<8x16xf32> to vector<8xf32>
    %69 = vector.shape_cast %68 : vector<8xf32> to vector<8x1xf32>
    %cst_22 = arith.constant 0.000000e+00 : f32
    %70 = vector.broadcast %cst_22 : f32 to vector<8x125xf32>
    %71 = tpu.concatenate %49, %59, %69, %70 in 1 : vector<8x1xf32>, vector<8x1xf32>, vector<8x1xf32>, vector<8x125xf32> -> vector<8x128xf32>
    %c0_23 = arith.constant 0 : index
    %c0_24 = arith.constant 0 : index
    %72 = vector.load %arg2[%c0_23, %c0_24] : memref<8x128xf32, #tpu.memory_space<vmem>>, vector<8x128xf32>
    tpu.vector_store %arg2[%c0_23, %c0_24], %71 {strides = array<i32>} : memref<8x128xf32, #tpu.memory_space<vmem>>, vector<8x128xf32>,
    return
  }
  func.func @transform_0(%arg0: i32) -> (i32, i32) {
    %c0_i32 = arith.constant 0 : i32
    %c0_i32_0 = arith.constant 0 : i32
    return %arg0, %c0_i32 : i32, i32
  }
  func.func @transform_1(%arg0: i32) -> (i32, i32) {
    %c0_i32 = arith.constant 0 : i32
    %c0_i32_0 = arith.constant 0 : i32
    return %arg0, %c0_i32 : i32, i32
  }
}

</mosaic_0001>

<bundles_post_ra>
// kernel: tpu_custom_call.1
= control target key start
LH: loop header
LB: loop body
LE: loop exit
PB: predicated region body
PF: predicated region fallthrough
CT: control target
= control target key end

     0   :  { %6 = vsyncpa [#allocation3], 0  ;;  %s302_s0 = inlined_call_operand.hbm [shape: f32[8,16], index: 0, kind: input, shape index: {}]   ;;  %s303_s1 = inlined_call_operand.hbm [shape: f32[8,128], index: 1, kind: output, shape index: {}]  }
   0x1   :  { %7 = vsyncpa [#allocation4], 0  ;;  %s227_s6 = smov [#allocation2]   ;;  %s179_s10 = scalar_lea.hbm %s302_s0, 128 }
   0x2   :  { %s14_s7 = sshll.u32 %s227_s6, 4  ;;  %p180_p0 = scmp.ne.s32.totalorder %s302_s0, %s179_s10  ;;  %s15_s7 = int_to_ptr.vmem [resolvable:$true] %s14_s7 }
   0x3   :  { %p183_p1 = scmp.lt.u32.totalorder %s179_s10, %s302_s0 }
   0x5   :  { %p185_p2 = pnand %p183_p1, %p180_p0 }
   0x7   :  { %188 = shalt.err (!%p185_p2)
}
   0x8   :  { %s189_s15 = scalar_lea.vmem %s15_s7, 128  ;;  %p194_p4 = scmp.lt.s32.totalorder %s15_s7, %s15_s7 }
   0x9   :  { %p190_p3 = scmp.ne.s32.totalorder %s15_s7, %s189_s15  ;;  %p195_p5 = scmp.lt.s32.totalorder %s189_s15, %s189_s15 }
   0xb   :  { %p196_p6 = por %p195_p5, %p194_p4 }
   0xd   :  { %p197_p7 = pnand %p196_p6, %p190_p3 }
   0xf   :  { %200 = shalt.err (!%p197_p7)
}
  0x10   :  { %17 = dma.hbm_to_vmem [thread:$0]  %s302_s0, 128, %s15_s7, [#allocation3]  }
  0x11   :  { %223 = dma.done.wait [#allocation3], 128  }
  0x12   :  { %224 = vsyncadd [#allocation3], 4294967168  ;;  %vm24_vm0 = vcmask 130048   ;;  %v251_v0 = vld [vmem:[#allocation2] sm:$0xff]  ;;  %v22_v2 = vlaneseq  ;;  %s228_s0 = smov [#allocation5]  }
  0x13   :  { %v25_v1 = vsel %vm24_vm0, %v251_v0, -inf  ;;  %s168_s18 = sshll.u32 %s228_s0, 4  ;;  %s169_s18 = int_to_ptr.vmem [resolvable:$true] %s168_s18 }
  0x14   :  { %26 = vmax.xlane.f32.xlu0 %v25_v1  ;;  %v255_v3 = vand.u32 127, %v22_v2  ;;  %s201_s19 = scalar_lea.vmem %s169_s18, 128  ;;  %p206_p9 = scmp.lt.s32.totalorder %s169_s18, %s169_s18 }
  0x15   :  { %p202_p8 = scmp.ne.s32.totalorder %s169_s18, %s201_s19  ;;  %p207_p10 = scmp.lt.s32.totalorder %s201_s19, %s201_s19 }
  0x17   :  { %p208_p11 = por %p207_p10, %p206_p9 }
  0x19   :  { %p209_p12 = pnand %p208_p11, %p202_p8 }
  0xa1   :  { %v27_v4 = vpop.xlane.xlu0 %26 }
  0xa2   :  { %vm28_vm1 = vcmp.eq.f32.partialorder %v251_v0, %v27_v4 }
  0xa3   :  { %v29_v5 = vsel %vm28_vm1, %v255_v3, 16 }
  0xa4   :  { %v30_v6 = vsel %vm24_vm0, %v29_v5, 2147483647 }
  0xa5   :  { %v32_v7 = vshra.s32 %v30_v6, 16  ;;  %v31_v9 = vand.u32 65535, %v30_v6 }
  0xa7   :  { %v34_v8 = vcvt.s32.f32 %v32_v7  ;;  %v33_v11 = vcvt.s32.f32 %v31_v9 }
  0xa9   :  { %35 = vmin.xlane.f32.xlu0 %v34_v8 }
 0x136   :  { %v36_v10 = vpop.xlane.xlu0 %35 }
 0x137   :  { %vm37_vm2 = vcmp.eq.f32.partialorder %v34_v8, %v36_v10  ;;  %v42_v13 = vcvt.f32.s32 %v36_v10 }
 0x138   :  { %v38_v12 = vsel %vm37_vm2, %v33_v11, inf }
 0x139   :  { %39 = vmin.xlane.f32.xlu1 %v38_v12  ;;  %v43_v15 = vshll.u32 %v42_v13, 16 }
 0x1c6   :  { %v40_v14 = vpop.xlane.xlu1 %39 }
 0x1c7   :  { %v41_v16 = vcvt.f32.s32 %v40_v14 }
 0x1c9   :  { %v44_v17 = vadd.s32 %v43_v15, %v41_v16 }
 0x1cb   :  { %vm45_vm3 = vcmp.eq.s32.totalorder %v255_v3, %v44_v17 }
 0x1cc   :  { %v46_v18 = vsel %vm45_vm3, -inf, %v251_v0 }
 0x1cd   :  { %v47_v19 = vsel %vm24_vm0, %v46_v18, -inf }
 0x1ce   :  { %48 = vmax.xlane.f32.xlu1 %v47_v19 }
 0x25b   :  { %v49_v20 = vpop.xlane.xlu1 %48 }
 0x25c   :  { %vm50_vm4 = vcmp.eq.f32.partialorder %v46_v18, %v49_v20 }
 0x25d   :  { %v51_v21 = vsel %vm50_vm4, %v255_v3, 16  ;;  %vm157_vm4 = vcmask 15360  }
 0x25e   :  { %v52_v22 = vsel %vm24_vm0, %v51_v21, 2147483647 }
 0x25f   :  { %v54_v23 = vshra.s32 %v52_v22, 16  ;;  %v53_v25 = vand.u32 65535, %v52_v22 }
 0x261   :  { %v56_v24 = vcvt.s32.f32 %v54_v23  ;;  %v55_v27 = vcvt.s32.f32 %v53_v25 }
 0x263   :  { %57 = vmin.xlane.f32.xlu0 %v56_v24 }
 0x2f0   :  { %v58_v26 = vpop.xlane.xlu0 %57 }
 0x2f1   :  { %vm59_vm5 = vcmp.eq.f32.partialorder %v56_v24, %v58_v26  ;;  %v64_v29 = vcvt.f32.s32 %v58_v26 }
 0x2f2   :  { %v60_v28 = vsel %vm59_vm5, %v55_v27, inf  ;;  %vm159_vm5 = vcmask 23552  }
 0x2f3   :  { %61 = vmin.xlane.f32.xlu1 %v60_v28  ;;  %v65_v31 = vshll.u32 %v64_v29, 16 }
 0x380   :  { %v62_v30 = vpop.xlane.xlu1 %61 }
 0x381   :  { %v63_v32 = vcvt.f32.s32 %v62_v30 }
 0x383   :  { %v66_v33 = vadd.s32 %v65_v31, %v63_v32 }
 0x385   :  { %vm67_vm6 = vcmp.eq.s32.totalorder %v255_v3, %v66_v33 }
 0x386   :  { %v69_v34 = vsel %vm67_vm6, -inf, %v46_v18  ;;  %vm68_vm9 = vmor %vm45_vm3, %vm67_vm6  ;;  %vm155_vm3 = vcmask 7168  }
 0x387   :  { %v70_v35 = vsel %vm24_vm0, %v69_v34, -inf }
 0x388   :  { %71 = vmax.xlane.f32.xlu0 %v70_v35 }
 0x415   :  { %v72_v36 = vpop.xlane.xlu0 %71 }
 0x416   :  { %vm73_vm7 = vcmp.eq.f32.partialorder %v69_v34, %v72_v36 }
 0x417   :  { %v74_v37 = vsel %vm73_vm7, %v255_v3, 16 }
 0x418   :  { %v75_v38 = vsel %vm24_vm0, %v74_v37, 2147483647 }
 0x419   :  { %v77_v39 = vshra.s32 %v75_v38, 16  ;;  %v76_v41 = vand.u32 65535, %v75_v38 }
 0x41b   :  { %v79_v40 = vcvt.s32.f32 %v77_v39  ;;  %v78_v43 = vcvt.s32.f32 %v76_v41 }
 0x41d   :  { %80 = vmin.xlane.f32.xlu1 %v79_v40 }
 0x4aa   :  { %v81_v42 = vpop.xlane.xlu1 %80 }
 0x4ab   :  { %vm82_vm8 = vcmp.eq.f32.partialorder %v79_v40, %v81_v42  ;;  %v87_v45 = vcvt.f32.s32 %v81_v42 }
 0x4ac   :  { %v83_v44 = vsel %vm82_vm8, %v78_v43, inf }
 0x4ad   :  { %84 = vmin.xlane.f32.xlu0 %v83_v44  ;;  %v88_v47 = vshll.u32 %v87_v45, 16 }
 0x53a   :  { %v85_v46 = vpop.xlane.xlu0 %84 }
 0x53b   :  { %v86_v48 = vcvt.f32.s32 %v85_v46 }
 0x53d   :  { %v89_v49 = vadd.s32 %v88_v47, %v86_v48 }
 0x53f   :  { %vm90_vm10 = vcmp.eq.s32.totalorder %v255_v3, %v89_v49 }
 0x540   :  { %vm91_vm11 = vmor %vm68_vm9, %vm90_vm10 }
 0x541   :  { %v92_v50 = vsel %vm91_vm11, %v255_v3, 16 }
 0x542   :  { %v93_v51 = vsel %vm24_vm0, %v92_v50, 2147483647 }
 0x543   :  { %v95_v52 = vshra.s32 %v93_v51, 16  ;;  %v94_v54 = vand.u32 65535, %v93_v51 }
 0x545   :  { %v97_v53 = vcvt.s32.f32 %v95_v52  ;;  %v96_v56 = vcvt.s32.f32 %v94_v54 }
 0x547   :  { %98 = vmin.xlane.f32.xlu1 %v97_v53 }
 0x5d4   :  { %v99_v55 = vpop.xlane.xlu1 %98 }
 0x5d5   :  { %vm100_vm12 = vcmp.eq.f32.partialorder %v97_v53, %v99_v55  ;;  %v105_v58 = vcvt.f32.s32 %v99_v55 }
 0x5d6   :  { %v101_v57 = vsel %vm100_vm12, %v96_v56, inf }
 0x5d7   :  { %102 = vmin.xlane.f32.xlu0 %v101_v57  ;;  %v106_v60 = vshll.u32 %v105_v58, 16 }
 0x664   :  { %v103_v59 = vpop.xlane.xlu0 %102 }
 0x665   :  { %v104_v61 = vcvt.f32.s32 %v103_v59 }
 0x667   :  { %v107_v62 = vadd.s32 %v106_v60, %v104_v61 }
 0x669   :  { %vm108_vm13 = vcmp.eq.s32.totalorder %v92_v50, %v107_v62 }
 0x66a   :  { %v113_v63 = vsel %vm108_vm13, 16, %v92_v50  ;;  %v109_v17 = vsel %vm108_vm13, %v251_v0, 0.0 }
 0x66b   :  { %v114_v1 = vsel %vm24_vm0, %v113_v63, 2147483647  ;;  %v110_v18 = vsel %vm24_vm0, %v109_v17, 0.0 }
 0x66c   :  { %v116_v2 = vshra.s32 %v114_v1, 16  ;;  %v115_v4 = vand.u32 65535, %v114_v1 }
 0x66e   :  { %v118_v3 = vcvt.s32.f32 %v116_v2  ;;  %v117_v6 = vcvt.s32.f32 %v115_v4 }
 0x670   :  { %119 = vmin.xlane.f32.xlu1 %v118_v3 }
 0x6fd   :  { %v120_v5 = vpop.xlane.xlu1 %119 }
 0x6fe   :  { %vm121_vm14 = vcmp.eq.f32.partialorder %v118_v3, %v120_v5  ;;  %v126_v8 = vcvt.f32.s32 %v120_v5 }
 0x6ff   :  { %v122_v7 = vsel %vm121_vm14, %v117_v6, inf }
 0x700   :  { %123 = vmin.xlane.f32.xlu0 %v122_v7  ;;  %v127_v10 = vshll.u32 %v126_v8, 16 }
 0x78d   :  { %v124_v9 = vpop.xlane.xlu0 %123 }
 0x78e   :  { %v125_v11 = vcvt.f32.s32 %v124_v9 }
 0x790   :  { %v128_v12 = vadd.s32 %v127_v10, %v125_v11 }
 0x792   :  { %vm129_vm15 = vcmp.eq.s32.totalorder %v113_v63, %v128_v12 }
 0x793   :  { %v134_v13 = vsel %vm129_vm15, 16, %v113_v63  ;;  %v130_v23 = vsel %vm129_vm15, %v251_v0, 0.0 }
 0x794   :  { %v135_v14 = vsel %vm24_vm0, %v134_v13, 2147483647  ;;  %v131_v24 = vsel %vm24_vm0, %v130_v23, 0.0 }
 0x795   :  { %v137_v15 = vshra.s32 %v135_v14, 16  ;;  %v136_v19 = vand.u32 65535, %v135_v14 }
 0x797   :  { %v139_v16 = vcvt.s32.f32 %v137_v15  ;;  %v138_v21 = vcvt.s32.f32 %v136_v19 }
 0x799   :  { %140 = vmin.xlane.f32.xlu1 %v139_v16 }
 0x79d   :  { %111 = vadd.xlane.f32.xlu1 %v110_v18 }
 0x826   :  { %v141_v20 = vpop.xlane.xlu1 %140 }
 0x827   :  { %vm142_vm1 = vcmp.eq.f32.partialorder %v139_v16, %v141_v20  ;;  %v147_v25 = vcvt.f32.s32 %v141_v20 }
 0x828   :  { %v143_v22 = vsel %vm142_vm1, %v138_v21, inf }
 0x829   :  { %144 = vmin.xlane.f32.xlu0 %v143_v22  ;;  %v148_v27 = vshll.u32 %v147_v25, 16 }
 0x82a   :  { %v112_v32 = vpop.xlane.xlu1 %111 }
 0x82d   :  { %132 = vadd.xlane.f32.xlu0 %v131_v24 }
 0x8b6   :  { %v145_v26 = vpop.xlane.xlu0 %144 }
 0x8b7   :  { %v146_v28 = vcvt.f32.s32 %v145_v26 }
 0x8b9   :  { %v149_v29 = vadd.s32 %v148_v27, %v146_v28 }
 0x8ba   :  { %v133_v33 = vpop.xlane.xlu0 %132 }
 0x8bb   :  { %vm150_vm2 = vcmp.eq.s32.totalorder %v134_v13, %v149_v29  ;;  %v156_v34 = vsel %vm155_vm3, %v112_v32, %v133_v33 }
 0x8bc   :  { %v151_v30 = vsel %vm150_vm2, %v251_v0, 0.0 }
 0x8bd   :  { %v152_v31 = vsel %vm24_vm0, %v151_v30, 0.0 }
 0x8be   :  { %153 = vadd.xlane.f32.xlu1 %v152_v31 }
 0x94b   :  { %v154_v35 = vpop.xlane.xlu1 %153 }
 0x94c   :  { %v158_v36 = vsel %vm157_vm4, %v156_v34, %v154_v35 }
 0x94d   :  { %v160_v37 = vsel %vm159_vm5, %v158_v36, 0.0 }
 0x94e   :  { %161 = vst [vmem:[#allocation5] sm:$0xff] %v160_v37 }
 0x94f   :  { %212 = shalt.err (!%p209_p12)
}
 0x950   :  { %s213_s22 = scalar_lea.hbm %s303_s1, 128 }
 0x951   :  { %p214_p13 = scmp.ne.s32.totalorder %s303_s1, %s213_s22  ;;  %p217_p0 = scmp.lt.u32.totalorder %s213_s22, %s303_s1 }
 0x953   :  { %p219_p1 = pnand %p217_p0, %p214_p13 }
 0x955   :  { %222 = shalt.err (!%p219_p1)
}
 0x956   :  { %171 = dma.vmem_to_hbm [thread:$0]  %s169_s18, 128, %s303_s1, [#allocation4]  }
 0x957   :  { %225 = dma.done.wait [#allocation4], 128  }
 0x958   :  { %226 = vsyncadd [#allocation4], 4294967168 }
 0x959   :  { %175 = vsyncpa [#allocation3], 1 }
 0x95a   :  { %176 = vsyncpa [#allocation4], 1 }

</bundles_post_ra>
